<compile_context>
chip_gen: v7x
topology: tpu7x:2x2x1
jax: 0.10.0
libtpu: 0.0.40
codegen_flags: <defaults>
</compile_context>

<pallas_src>
import functools

import jax
import jax.numpy as jnp
from jax.experimental import pallas as pl
from jax.experimental.pallas import tpu as pltpu


VMEM_LIMIT_BYTES = 32 * 1024 * 1024  # safe on v5e / v6e / v7x scoped VMEM


def _pick_tile(dim, preferred, align):
    """Largest tile <= preferred that is a multiple of `align` and divides
    `dim`; falls back to the full dimension (always legal for BlockSpec)."""
    if dim <= preferred:
        return dim
    t = (preferred // align) * align
    while t >= align:
        if dim % t == 0:
            return t
        t -= align
    return dim


# ----------------------------------------------------------------------------
# Kernel epilogues (shared between single-K and accumulating variants)
# ----------------------------------------------------------------------------

def _linear_epilogue(y, b, activation):
    y = y + b.astype(jnp.float32)
    if activation == "gelu":
        y = jax.nn.gelu(y, approximate=False)   # exact GELU like HF RoBERTa
    return y


def _res_ln_epilogue(h, r, g, bb, eps):
    h = h + r.astype(jnp.float32)
    mu = jnp.mean(h, axis=-1, keepdims=True)
    var = jnp.mean(jnp.square(h - mu), axis=-1, keepdims=True)
    inv = jax.lax.rsqrt(var + eps)
    return (h - mu) * inv * g.astype(jnp.float32) + bb.astype(jnp.float32)


# ----------------------------------------------------------------------------
# Pallas kernels
# ----------------------------------------------------------------------------

def _matmul_kernel(x_ref, w_ref, b_ref, o_ref, *, activation):
    # Single K step: no scratch accumulator, compute + epilogue + store.
    y = jnp.dot(x_ref[...], w_ref[...], preferred_element_type=jnp.float32)
    o_ref[...] = _linear_epilogue(y, b_ref[...], activation).astype(o_ref.dtype)


def _matmul_acc_kernel(x_ref, w_ref, b_ref, o_ref, acc_ref, *, activation):
    # grid = (M/tm, N/tn, K/tk); K innermost ("arbitrary"); acc in f32 VMEM.
    @pl.when(pl.program_id(2) == 0)
    def _():
        acc_ref[...] = jnp.zeros_like(acc_ref)

    acc_ref[...] += jnp.dot(x_ref[...], w_ref[...],
                            preferred_element_type=jnp.float32)

    @pl.when(pl.program_id(2) == pl.num_programs(2) - 1)
    def _():
        o_ref[...] = _linear_epilogue(acc_ref[...], b_ref[...],
                                      activation).astype(o_ref.dtype)


def _matmul_res_ln_kernel(x_ref, w_ref, b_ref, r_ref, g_ref, bb_ref,
                          o_ref, *, eps):
    # o = LayerNorm(x @ w + b + residual) * gamma + beta, single K step.
    h = (jnp.dot(x_ref[...], w_ref[...], preferred_element_type=jnp.float32)
         + b_ref[...].astype(jnp.float32))
    o_ref[...] = _res_ln_epilogue(h, r_ref[...], g_ref[...], bb_ref[...],
                                  eps).astype(o_ref.dtype)


def _matmul_res_ln_acc_kernel(x_ref, w_ref, b_ref, r_ref, g_ref, bb_ref,
                              o_ref, acc_ref, *, eps):
    # grid = (M/tm, K/tk); N (=H) kept whole so the LayerNorm can be fused.
    @pl.when(pl.program_id(1) == 0)
    def _():
        acc_ref[...] = jnp.zeros_like(acc_ref)

    acc_ref[...] += jnp.dot(x_ref[...], w_ref[...],
                            preferred_element_type=jnp.float32)

    @pl.when(pl.program_id(1) == pl.num_programs(1) - 1)
    def _():
        h = acc_ref[...] + b_ref[...].astype(jnp.float32)
        o_ref[...] = _res_ln_epilogue(h, r_ref[...], g_ref[...], bb_ref[...],
                                      eps).astype(o_ref.dtype)


def _emb_layernorm_kernel(we_ref, pe_ref, te_ref, g_ref, b_ref, o_ref, *, eps):
    # Fused word + position + type embedding sum and LayerNorm.
    h = (we_ref[...].astype(jnp.float32)
         + pe_ref[...].astype(jnp.float32)
         + te_ref[...].astype(jnp.float32))
    mu = jnp.mean(h, axis=-1, keepdims=True)
    var = jnp.mean(jnp.square(h - mu), axis=-1, keepdims=True)
    inv = jax.lax.rsqrt(var + eps)
    o_ref[...] = ((h - mu) * inv * g_ref[...].astype(jnp.float32)
                  + b_ref[...].astype(jnp.float32)).astype(o_ref.dtype)


def _attention_kernel(q_ref, k_ref, v_ref, bias_ref, o_ref, *, scale, hg, hd):
    # One (batch, head-group) per grid step.  Blocks are (S, hg*hd) with
    # hg*hd >= 128 lanes; heads inside the group are processed one at a time
    # (static unrolled loop) so scores never mix heads.
    bias = bias_ref[...].astype(jnp.float32)                   # (1, S)
    scale_c = jnp.asarray(scale, q_ref.dtype)
    for h in range(hg):
        lo, hi = h * hd, (h + 1) * hd
        qh = q_ref[:, lo:hi] * scale_c                          # pre-scaled Q
        kh = k_ref[:, lo:hi]
        vh = v_ref[:, lo:hi]
        # contract on the last dim directly (no transposed K materialization)
        s = jax.lax.dot_general(qh, kh, (((1,), (1,)), ((), ())),
                                preferred_element_type=jnp.float32)  # (S, S)
        s = s + bias
        s = s - jnp.max(s, axis=-1, keepdims=True)
        p = jnp.exp(s)
        p = p * pl.reciprocal(jnp.sum(p, axis=-1, keepdims=True), approx=True)
        ctx = jnp.dot(p.astype(vh.dtype), vh,
                      preferred_element_type=jnp.float32)       # (S, hd)
        o_ref[:, lo:hi] = ctx.astype(o_ref.dtype)


# ----------------------------------------------------------------------------
# pallas_call wrappers
# ----------------------------------------------------------------------------

def pallas_linear(x, w, b, activation=None, out_dtype=None,
                  tm_pref=256, tn_pref=256, tk_pref=512):
    """Tiled x:(M,K) @ w:(K,N) + b:(1,N) with optional GELU epilogue."""
    M, K = x.shape
    N = w.shape[1]
    tm = _pick_tile(M, tm_pref, 8)
    tn = _pick_tile(N, tn_pref, 128)
    tk = _pick_tile(K, tk_pref, 128)
    nk = K // tk
    out_shape = jax.ShapeDtypeStruct((M, N), out_dtype or x.dtype)

    if nk == 1:
        # no accumulation needed: skip the scratch buffer entirely
        kernel = functools.partial(_matmul_kernel, activation=activation)
        grid_spec = pltpu.PrefetchScalarGridSpec(
            num_scalar_prefetch=0,
            grid=(M // tm, N // tn),
            in_specs=[
                pl.BlockSpec((tm, K), lambda i, j: (i, 0)),
                pl.BlockSpec((K, tn), lambda i, j: (0, j)),
                pl.BlockSpec((1, tn), lambda i, j: (0, j)),
            ],
            out_specs=pl.BlockSpec((tm, tn), lambda i, j: (i, j)),
        )
        semantics = ("parallel", "parallel")
    else:
        kernel = functools.partial(_matmul_acc_kernel, activation=activation)
        grid_spec = pltpu.PrefetchScalarGridSpec(
            num_scalar_prefetch=0,
            grid=(M // tm, N // tn, nk),
            in_specs=[
                pl.BlockSpec((tm, tk), lambda i, j, k: (i, k)),
                pl.BlockSpec((tk, tn), lambda i, j, k: (k, j)),
                pl.BlockSpec((1, tn), lambda i, j, k: (0, j)),
            ],
            out_specs=pl.BlockSpec((tm, tn), lambda i, j, k: (i, j)),
            scratch_shapes=[pltpu.VMEM((tm, tn), jnp.float32)],
        )
        semantics = ("parallel", "parallel", "arbitrary")

    return pl.pallas_call(
        kernel,
        out_shape=out_shape,
        grid_spec=grid_spec,
        compiler_params=pltpu.CompilerParams(
            dimension_semantics=semantics,
            vmem_limit_bytes=VMEM_LIMIT_BYTES),
    )(x, w, b)


def pallas_linear_residual_layernorm(x, w, b, res, gamma, beta, eps=1e-5,
                                     tm_pref=256, tk_pref=512):
    """LayerNorm(x @ w + b + res) * gamma + beta, fully fused."""
    M, K = x.shape
    N = w.shape[1]
    tm = _pick_tile(M, tm_pref, 8)
    tk = _pick_tile(K, tk_pref, 128)
    nk = K // tk
    out_shape = jax.ShapeDtypeStruct((M, N), x.dtype)

    if nk == 1:
        kernel = functools.partial(_matmul_res_ln_kernel, eps=eps)
        grid_spec = pltpu.PrefetchScalarGridSpec(
            num_scalar_prefetch=0,
            grid=(M // tm,),
            in_specs=[
                pl.BlockSpec((tm, K), lambda i: (i, 0)),
                pl.BlockSpec((K, N), lambda i: (0, 0)),
                pl.BlockSpec((1, N), lambda i: (0, 0)),
                pl.BlockSpec((tm, N), lambda i: (i, 0)),   # residual
                pl.BlockSpec((1, N), lambda i: (0, 0)),    # gamma
                pl.BlockSpec((1, N), lambda i: (0, 0)),    # beta
            ],
            out_specs=pl.BlockSpec((tm, N), lambda i: (i, 0)),
        )
        semantics = ("parallel",)
    else:
        kernel = functools.partial(_matmul_res_ln_acc_kernel, eps=eps)
        grid_spec = pltpu.PrefetchScalarGridSpec(
            num_scalar_prefetch=0,
            grid=(M // tm, nk),
            in_specs=[
                pl.BlockSpec((tm, tk), lambda i, k: (i, k)),
                pl.BlockSpec((tk, N), lambda i, k: (k, 0)),
                pl.BlockSpec((1, N), lambda i, k: (0, 0)),
                pl.BlockSpec((tm, N), lambda i, k: (i, 0)),   # residual
                pl.BlockSpec((1, N), lambda i, k: (0, 0)),    # gamma
                pl.BlockSpec((1, N), lambda i, k: (0, 0)),    # beta
            ],
            out_specs=pl.BlockSpec((tm, N), lambda i, k: (i, 0)),
            scratch_shapes=[pltpu.VMEM((tm, N), jnp.float32)],
        )
        semantics = ("parallel", "arbitrary")

    return pl.pallas_call(
        kernel,
        out_shape=out_shape,
        grid_spec=grid_spec,
        compiler_params=pltpu.CompilerParams(
            dimension_semantics=semantics,
            vmem_limit_bytes=VMEM_LIMIT_BYTES),
    )(x, w, b, res, gamma, beta)


def pallas_embedding_layernorm(word_e, pos_e, type_e, gamma, beta, eps=1e-5,
                               tm_pref=512):
    """Fused (word + pos + type) embedding sum and LayerNorm.  Inputs (M,H)."""
    M, H = word_e.shape
    tm = _pick_tile(M, tm_pref, 8)
    kernel = functools.partial(_emb_layernorm_kernel, eps=eps)
    return pl.pallas_call(
        kernel,
        out_shape=jax.ShapeDtypeStruct((M, H), word_e.dtype),
        grid=(M // tm,),
        in_specs=[
            pl.BlockSpec((tm, H), lambda i: (i, 0)),
            pl.BlockSpec((tm, H), lambda i: (i, 0)),
            pl.BlockSpec((1, H), lambda i: (0, 0)),
            pl.BlockSpec((1, H), lambda i: (0, 0)),
            pl.BlockSpec((1, H), lambda i: (0, 0)),
        ],
        out_specs=pl.BlockSpec((tm, H), lambda i: (i, 0)),
        compiler_params=pltpu.CompilerParams(
            dimension_semantics=("parallel",),
            vmem_limit_bytes=VMEM_LIMIT_BYTES),
    )(word_e, pos_e, type_e, gamma, beta)


def pallas_attention(qkv, bias, heads, head_dim):
    """qkv:(B,S,3H) packed [Q|K|V] (each head-major), bias:(B,1,S) additive.
    Returns context (B,S,H) with heads concatenated along H — no transposes."""
    B, S, threeH = qkv.shape
    H = threeH // 3
    assert H == heads * head_dim

    # group heads so the block lane width is a multiple of 128 where possible
    hg = heads
    for d in range(1, heads + 1):
        if heads % d == 0 and (d * head_dim) % 128 == 0:
            hg = d
            break
    else:
        for d in range(1, heads + 1):
            if heads % d == 0 and d * head_dim >= 128:
                hg = d
                break
    ng = heads // hg
    blk = hg * head_dim
    scale = 1.0 / (head_dim ** 0.5)

    q_spec = pl.BlockSpec((None, S, blk), lambda b, g: (b, 0, g))
    k_spec = pl.BlockSpec((None, S, blk), lambda b, g: (b, 0, ng + g))
    v_spec = pl.BlockSpec((None, S, blk), lambda b, g: (b, 0, 2 * ng + g))
    bias_spec = pl.BlockSpec((None, 1, S), lambda b, g: (b, 0, 0))

    kernel = functools.partial(_attention_kernel, scale=scale, hg=hg,
                               hd=head_dim)
    return pl.pallas_call(
        kernel,
        out_shape=jax.ShapeDtypeStruct((B, S, H), qkv.dtype),
        grid=(B, ng),
        in_specs=[q_spec, k_spec, v_spec, bias_spec],
        out_specs=pl.BlockSpec((None, S, blk), lambda b, g: (b, 0, g)),
        compiler_params=pltpu.CompilerParams(
            dimension_semantics=("parallel", "parallel"),
            vmem_limit_bytes=VMEM_LIMIT_BYTES),
    )(qkv, qkv, qkv, bias)


# ----------------------------------------------------------------------------
# Synthetic RoBERTa-style encoder + Conv1D(k=1) head built from the kernels
# ----------------------------------------------------------------------------

def init_params(key, *, vocab, max_pos, hidden, heads, inter, layers, latent):
    std = 0.02
    keys = jax.random.split(key, 4 + layers * 4)
    ki = iter(range(len(keys)))

    def w(shape):
        return (std * jax.random.normal(keys[next(ki)], shape,
                                        jnp.float32)).astype(jnp.bfloat16)

    def zeros(n):
        return jnp.zeros((1, n), jnp.float32)

    params = {
        "word_emb": w((vocab, hidden)),
        "pos_emb": w((max_pos, hidden)),
        "type_emb": w((2, hidden)),
        "emb_ln_g": jnp.ones((1, hidden), jnp.float32),
        "emb_ln_b": zeros(hidden),
        "layers": [],
    }
    for _ in range(layers):
        params["layers"].append({
            # packed QKV projection: columns [Q(head-major) | K | V]
            "w_qkv": w((hidden, 3 * hidden)), "b_qkv": zeros(3 * hidden),
            "wo": w((hidden, hidden)), "bo": zeros(hidden),
            "ln1_g": jnp.ones((1, hidden), jnp.float32), "ln1_b": zeros(hidden),
            "wi": w((hidden, inter)), "bi": zeros(inter),
            "wo2": w((inter, hidden)), "bo2": zeros(hidden),
            "ln2_g": jnp.ones((1, hidden), jnp.float32), "ln2_b": zeros(hidden),
        })
    # Conv1D(kernel_size=1) == per-token linear H -> latent
    params["conv_w"] = w((hidden, latent))
    params["conv_b"] = zeros(latent)
    params["heads"] = heads
    return params


def encoder_layer(x, bias, p, heads):
    B, S, H = x.shape
    hd = H // heads
    xf = x.reshape(B * S, H)

    # fused Q/K/V projection: one read of the activation, one matmul
    qkv = pallas_linear(xf, p["w_qkv"], p["b_qkv"]).reshape(B, S, 3 * H)

    # per-(batch, head-group) attention, context written directly as (B,S,H)
    ctx = pallas_attention(qkv, bias, heads, hd).reshape(B * S, H)

    # attention output projection + residual + LayerNorm (fused)
    x1 = pallas_linear_residual_layernorm(ctx, p["wo"], p["bo"], xf,
                                          p["ln1_g"], p["ln1_b"])
    # FFN up-projection with GELU epilogue
    ff = pallas_linear(x1, p["wi"], p["bi"], activation="gelu")
    # FFN down-projection + residual + LayerNorm (fused)
    x2 = pallas_linear_residual_layernorm(ff, p["wo2"], p["bo2"], x1,
                                          p["ln2_g"], p["ln2_b"])
    return x2.reshape(B, S, H)


def roberta_encoder_forward(params, token_ids, attn_mask):
    """Mirrors RobertaEncoder.forward: returns (emb_token, mask).

    token_ids : (B, S) int32   attn_mask : (B, S) bool
    emb_token : (B, S, latent) float32
    """
    B, S = token_ids.shape
    H = params["word_emb"].shape[1]
    heads = params["heads"]
    pad_idx = 1

    # RoBERTa-style position ids: cumsum over the mask, offset by padding_idx.
    mask_i = attn_mask.astype(jnp.int32)
    pos_ids = jnp.cumsum(mask_i, axis=1) * mask_i + pad_idx

    # TODO(synk): data-dependent embedding row gathers stay in XLA; a manual
    # DMA-gather Pallas kernel is not worthwhile for this table size.
    word_e = params["word_emb"][token_ids].reshape(B * S, H)
    pos_e = params["pos_emb"][pos_ids].reshape(B * S, H)
    type_e = params["type_emb"][0][None, :]

    # fused embedding-sum + LayerNorm (pre-LN activation never hits HBM)
    x = pallas_embedding_layernorm(word_e, pos_e, type_e,
                                   params["emb_ln_g"], params["emb_ln_b"])
    x = x.reshape(B, S, H)

    # additive attention bias over keys: 0 where valid, -1e9 where padded
    bias = jnp.where(attn_mask, 0.0, -1e9).astype(jnp.float32)[:, None, :]

    for lyr in params["layers"]:
        x = encoder_layer(x, bias, lyr, heads)

    # Conv1D(kernel_size=1) head: pad output columns to a multiple of 128 so
    # the kernel's stores are lane-dense, slice the real latent dim outside.
    latent = params["conv_w"].shape[1]
    cw, cb = params["conv_w"], params["conv_b"]
    pad = (-latent) % 128
    if pad:
        cw = jnp.pad(cw, ((0, 0), (0, pad)))
        cb = jnp.pad(cb, ((0, 0), (0, pad)))
    emb_token = pallas_linear(x.reshape(B * S, H), cw, cb,
                              out_dtype=jnp.float32)
    emb_token = emb_token[:, :latent].reshape(B, S, latent)
    return emb_token, attn_mask.astype(bool)


# ----------------------------------------------------------------------------
# TODO(synk): tokenizer (text -> ids), pretrained-checkpoint loading and LoRA
# have no Pallas equivalent; synthetic token ids + padding mask stand in for
# `self.tokenizer(texts, ...)` and random weights for the HF checkpoint.
# ----------------------------------------------------------------------------

if __name__ == "__main__":
    B, S = 2, 16                 # batch, sequence length
    HIDDEN, HEADS = 256, 4       # hidden size, attention heads (head_dim 64)
    INTER, LAYERS = 512, 2       # FFN intermediate size, num transformer layers
    LATENT = 128                 # Conv1D output (latent_dim)
    VOCAB, MAX_POS = 100, 64

    key = jax.random.PRNGKey(0)
    pkey, tkey = jax.random.split(key)

    params = init_params(pkey, vocab=VOCAB, max_pos=MAX_POS, hidden=HIDDEN,
                         heads=HEADS, inter=INTER, layers=LAYERS, latent=LATENT)

    # synthetic tokenized batch: second sequence padded after 10 tokens
    token_ids = jax.random.randint(tkey, (B, S), 3, VOCAB, dtype=jnp.int32)
    lengths = jnp.array([S, 10], dtype=jnp.int32)
    attn_mask = jnp.arange(S)[None, :] < lengths[:, None]        # (B, S) bool
    token_ids = jnp.where(attn_mask, token_ids, 1)               # pad id = 1

    emb_token, mask_out = roberta_encoder_forward(params, token_ids, attn_mask)
    jax.block_until_ready(emb_token)

    assert emb_token.shape == (B, S, LATENT)
    assert emb_token.dtype == jnp.float32
    assert bool(jnp.all(jnp.isfinite(emb_token)))
    assert mask_out.shape == (B, S) and mask_out.dtype == jnp.bool_
    print("KERNEL_OK")
</pallas_src>

<mosaic_0001>
module attributes {stable_mosaic.version = 11 : i64} {
  func.func @_emb_layernorm_kernel(%arg0: i32, %arg1: memref<32x256xbf16, #tpu.memory_space<vmem>>, %arg2: memref<32x256xbf16, #tpu.memory_space<vmem>>, %arg3: memref<1x256xbf16, #tpu.memory_space<vmem>>, %arg4: memref<1x256xf32, #tpu.memory_space<vmem>>, %arg5: memref<1x256xf32, #tpu.memory_space<vmem>>, %arg6: memref<32x256xbf16, #tpu.memory_space<vmem>>) attributes {dimension_semantics = [#tpu.dimension_semantics<parallel>], iteration_bounds = array<i64: 1>, scalar_prefetch = 0 : i64, scratch_operands = 0 : i64, tpu.core_type = #tpu.core_type<tc>, window_params = [{transform_indices = @transform_0, window_bounds = array<i64: 32, 256>}, {transform_indices = @transform_1, window_bounds = array<i64: 32, 256>}, {pipeline_mode = #tpu.pipeline_mode<synchronous>, transform_indices = @transform_2, window_bounds = array<i64: 1, 256>}, {pipeline_mode = #tpu.pipeline_mode<synchronous>, transform_indices = @transform_3, window_bounds = array<i64: 1, 256>}, {pipeline_mode = #tpu.pipeline_mode<synchronous>, transform_indices = @transform_4, window_bounds = array<i64: 1, 256>}, {transform_indices = @transform_5, window_bounds = array<i64: 32, 256>}]} {
    %c0 = arith.constant 0 : index
    %c0_0 = arith.constant 0 : index
    %0 = vector.load %arg1[%c0, %c0_0] : memref<32x256xbf16, #tpu.memory_space<vmem>>, vector<32x256xbf16>
    %1 = arith.extf %0 : vector<32x256xbf16> to vector<32x256xf32>
    %c0_1 = arith.constant 0 : index
    %c0_2 = arith.constant 0 : index
    %2 = vector.load %arg2[%c0_1, %c0_2] : memref<32x256xbf16, #tpu.memory_space<vmem>>, vector<32x256xbf16>
    %3 = arith.extf %2 : vector<32x256xbf16> to vector<32x256xf32>
    %4 = arith.addf %1, %3 : vector<32x256xf32>
    %c0_3 = arith.constant 0 : index
    %c0_4 = arith.constant 0 : index
    %5 = vector.load %arg3[%c0_3, %c0_4] : memref<1x256xbf16, #tpu.memory_space<vmem>>, vector<1x256xbf16>
    %6 = arith.extf %5 : vector<1x256xbf16> to vector<1x256xf32>
    %7 = vector.broadcast %6 : vector<1x256xf32> to vector<32x256xf32>
    %8 = arith.addf %4, %7 : vector<32x256xf32>
    %cst = arith.constant dense<0.000000e+00> : vector<32xf32>
    %9 = vector.multi_reduction <add>, %8, %cst [1] : vector<32x256xf32> to vector<32xf32>
    %10 = vector.shape_cast %9 : vector<32xf32> to vector<32x1xf32>
    %cst_5 = arith.constant 2.560000e+02 : f32
    %11 = vector.broadcast %cst_5 : f32 to vector<32x1xf32>
    %12 = arith.divf %10, %11 : vector<32x1xf32>
    %13 = vector.broadcast %12 : vector<32x1xf32> to vector<32x256xf32>
    %14 = arith.subf %8, %13 : vector<32x256xf32>
    %15 = arith.mulf %14, %14 : vector<32x256xf32>
    %cst_6 = arith.constant dense<0.000000e+00> : vector<32xf32>
    %16 = vector.multi_reduction <add>, %15, %cst_6 [1] : vector<32x256xf32> to vector<32xf32>
    %17 = vector.shape_cast %16 : vector<32xf32> to vector<32x1xf32>
    %cst_7 = arith.constant 2.560000e+02 : f32
    %18 = vector.broadcast %cst_7 : f32 to vector<32x1xf32>
    %19 = arith.divf %17, %18 : vector<32x1xf32>
    %cst_8 = arith.constant 9.99999974E-6 : f32
    %20 = vector.broadcast %cst_8 : f32 to vector<32x1xf32>
    %21 = arith.addf %19, %20 : vector<32x1xf32>
    %22 = math.rsqrt %21 : vector<32x1xf32>
    %23 = vector.broadcast %12 : vector<32x1xf32> to vector<32x256xf32>
    %24 = arith.subf %8, %23 : vector<32x256xf32>
    %25 = vector.broadcast %22 : vector<32x1xf32> to vector<32x256xf32>
    %26 = arith.mulf %24, %25 : vector<32x256xf32>
    %c0_9 = arith.constant 0 : index
    %c0_10 = arith.constant 0 : index
    %27 = vector.load %arg4[%c0_9, %c0_10] : memref<1x256xf32, #tpu.memory_space<vmem>>, vector<1x256xf32>
    %28 = vector.broadcast %27 : vector<1x256xf32> to vector<32x256xf32>
    %29 = arith.mulf %26, %28 : vector<32x256xf32>
    %c0_11 = arith.constant 0 : index
    %c0_12 = arith.constant 0 : index
    %30 = vector.load %arg5[%c0_11, %c0_12] : memref<1x256xf32, #tpu.memory_space<vmem>>, vector<1x256xf32>
    %31 = vector.broadcast %30 : vector<1x256xf32> to vector<32x256xf32>
    %32 = arith.addf %29, %31 : vector<32x256xf32>
    %33 = arith.truncf %32 : vector<32x256xf32> to vector<32x256xbf16>
    %c0_13 = arith.constant 0 : index
    %c0_14 = arith.constant 0 : index
    %34 = vector.load %arg6[%c0_13, %c0_14] : memref<32x256xbf16, #tpu.memory_space<vmem>>, vector<32x256xbf16>
    tpu.vector_store %arg6[%c0_13, %c0_14], %33 {strides = array<i32>} : memref<32x256xbf16, #tpu.memory_space<vmem>>, vector<32x256xbf16>,
    return
  }
  func.func @transform_0(%arg0: i32) -> (i32, i32) {
    %c0_i32 = arith.constant 0 : i32
    %c0_i32_0 = arith.constant 0 : i32
    return %arg0, %c0_i32 : i32, i32
  }
  func.func @transform_1(%arg0: i32) -> (i32, i32) {
    %c0_i32 = arith.constant 0 : i32
    %c0_i32_0 = arith.constant 0 : i32
    return %arg0, %c0_i32 : i32, i32
  }
  func.func @transform_2(%arg0: i32) -> (i32, i32) {
    %c0_i32 = arith.constant 0 : i32
    %c0_i32_0 = arith.constant 0 : i32
    %c0_i32_1 = arith.constant 0 : i32
    return %c0_i32, %c0_i32_0 : i32, i32
  }
  func.func @transform_3(%arg0: i32) -> (i32, i32) {
    %c0_i32 = arith.constant 0 : i32
    %c0_i32_0 = arith.constant 0 : i32
    %c0_i32_1 = arith.constant 0 : i32
    return %c0_i32, %c0_i32_0 : i32, i32
  }
  func.func @transform_4(%arg0: i32) -> (i32, i32) {
    %c0_i32 = arith.constant 0 : i32
    %c0_i32_0 = arith.constant 0 : i32
    %c0_i32_1 = arith.constant 0 : i32
    return %c0_i32, %c0_i32_0 : i32, i32
  }
  func.func @transform_5(%arg0: i32) -> (i32, i32) {
    %c0_i32 = arith.constant 0 : i32
    %c0_i32_0 = arith.constant 0 : i32
    return %arg0, %c0_i32 : i32, i32
  }
}

</mosaic_0001>

<bundles_post_ra>
// kernel: tpu_custom_call.1
= control target key start
LH: loop header
LB: loop body
LE: loop exit
PB: predicated region body
PF: predicated region fallthrough
CT: control target
= control target key end

     0   :  { %10 = vsyncpa [#allocation3], 0  ;;  %s455_s0 = inlined_call_operand.hbm [shape: bf16[32,256], index: 0, kind: input, shape index: {}]   ;;  %s456_s1 = inlined_call_operand.hbm [shape: bf16[32,256], index: 1, kind: input, shape index: {}]   ;;  %s457_s2 = inlined_call_operand.vmem [shape: bf16[1,256], index: 2, kind: input, shape index: {}]   ;;  %s458_s3 = inlined_call_operand.vmem [shape: f32[1,256], index: 3, kind: input, shape index: {}]   ;;  %s459_s4 = inlined_call_operand.vmem [shape: f32[1,256], index: 4, kind: input, shape index: {}]   ;;  %s460_s5 = inlined_call_operand.hbm [shape: bf16[32,256], index: 5, kind: output, shape index: {}]  }
   0x1   :  { %11 = vsyncpa [#allocation6], 0 }
   0x2   :  { %12 = vsyncpa [#allocation4], 0  ;;  %s354_s18 = smov [#allocation2]   ;;  %s282_s22 = scalar_lea.hbm %s455_s0, 512 }
   0x3   :  { %s18_s19 = sshll.u32 %s354_s18, 4  ;;  %p283_p0 = scmp.ne.s32.totalorder %s455_s0, %s282_s22  ;;  %s19_s19 = int_to_ptr.vmem [resolvable:$true] %s18_s19 }
   0x4   :  { %p286_p1 = scmp.lt.u32.totalorder %s282_s22, %s455_s0 }
   0x6   :  { %p288_p2 = pnand %p286_p1, %p283_p0 }
   0x8   :  { %291 = shalt.err (!%p288_p2)
}
   0x9   :  { %s292_s27 = scalar_lea.vmem %s19_s19, 512  ;;  %p297_p4 = scmp.lt.s32.totalorder %s19_s19, %s19_s19 }
   0xa   :  { %p293_p3 = scmp.ne.s32.totalorder %s19_s19, %s292_s27  ;;  %p298_p5 = scmp.lt.s32.totalorder %s292_s27, %s292_s27 }
   0xc   :  { %p299_p6 = por %p298_p5, %p297_p4 }
   0xe   :  { %p300_p7 = pnand %p299_p6, %p293_p3 }
  0x10   :  { %303 = shalt.err (!%p300_p7)
}
  0x11   :  { %s355_s28 = smov 128   ;;  %s356_s29 = smov 8  }
  0x12   :  { %24 = dma.hbm_to_vmem [thread:$0]  %s455_s0, 512, %s19_s19, [#allocation3], %s355_s28, %s355_s28, %s356_s29  }
  0x13   :  { %s357_s7 = smov [#allocation5]   ;;  %s304_s11 = scalar_lea.hbm %s456_s1, 512 }
  0x14   :  { %s30_s8 = sshll.u32 %s357_s7, 4  ;;  %p305_p8 = scmp.ne.s32.totalorder %s456_s1, %s304_s11  ;;  %s31_s8 = int_to_ptr.vmem [resolvable:$true] %s30_s8 }
  0x15   :  { %p308_p9 = scmp.lt.u32.totalorder %s304_s11, %s456_s1 }
  0x17   :  { %p310_p10 = pnand %p308_p9, %p305_p8 }
  0x19   :  { %313 = shalt.err (!%p310_p10)
}
  0x1a   :  { %s314_s16 = scalar_lea.vmem %s31_s8, 512  ;;  %p319_p12 = scmp.lt.s32.totalorder %s31_s8, %s31_s8 }
  0x1b   :  { %p315_p11 = scmp.ne.s32.totalorder %s31_s8, %s314_s16  ;;  %p320_p13 = scmp.lt.s32.totalorder %s314_s16, %s314_s16 }
  0x1d   :  { %p321_p0 = por %p320_p13, %p319_p12 }
  0x1f   :  { %p322_p1 = pnand %p321_p0, %p315_p11 }
  0x21   :  { %325 = shalt.err (!%p322_p1)
}
  0x22   :  { %36 = dma.hbm_to_vmem [thread:$0]  %s456_s1, 512, %s31_s8, [#allocation6], %s355_s28, %s355_s28, %s356_s29  }
  0x23   :  { %348 = dma.done.wait [#allocation3], 512  }
  0x24   :  { %349 = vsyncadd [#allocation3], 4294966784 }
  0x25   :  { %350 = dma.done.wait [#allocation6], 512  }
  0x26   :  { %351 = vsyncadd [#allocation6], 4294966784  ;;  %v84_v0 = vlaneseq  ;;  %v49_v2 = vld [vmem:[#allocation2] sm:$0xff]  ;;  %v51_v11 = vld [vmem:[#allocation2 + $0x10] sm:$0xff] }
  0x27   :  { %v61_v3 = vld [vmem:[#allocation5] sm:$0xff]  ;;  %v53_v7 = vunpack.c.l.bf16 %v49_v2  ;;  %v54_v8 = vunpack.c.h.bf16 %v49_v2  ;;  %v63_v12 = vld [vmem:[#allocation5 + $0x10] sm:$0xff]  ;;  %v50_v13 = vld [vmem:[#allocation2 + $0x8] sm:$0xff]  ;;  %v57_v15 = vunpack.c.l.bf16 %v51_v11  ;;  %v58_v16 = vunpack.c.h.bf16 %v51_v11 }
  0x28   :  { %v419_v1 = vshrl.u32 %v84_v0, 7  ;;  %v81_v4 = vld [vmem:[%s457_s2] sm:$0x3]  ;;  %v65_v9 = vunpack.c.l.bf16 %v61_v3  ;;  %v66_v10 = vunpack.c.h.bf16 %v61_v3  ;;  %v69_v17 = vunpack.c.l.bf16 %v63_v12  ;;  %v62_v18 = vld [vmem:[#allocation5 + $0x8] sm:$0xff]  ;;  %v52_v19 = vld [vmem:[#allocation2 + $0x18] sm:$0xff] }
  0x29   :  { %v82_v14 = vunpack.c.l.bf16 %v81_v4  ;;  %v70_v22 = vunpack.c.h.bf16 %v63_v12  ;;  %v55_v23 = vunpack.c.l.bf16 %v50_v13  ;;  %v64_v24 = vld [vmem:[#allocation5 + $0x18] sm:$0xff]  ;;  %v56_v28 = vunpack.c.h.bf16 %v50_v13 }
  0x2a   :  { %v425_v5 = vsub.s32 0, %v419_v1  ;;  %v90_v6 = vsub.s32 2, %v419_v1  ;;  %v73_v20 = vadd.f32 %v65_v9, %v53_v7  ;;  %v74_v21 = vadd.f32 %v66_v10, %v54_v8 }
  0x2b   :  { %v77_v27 = vadd.f32 %v69_v17, %v57_v15  ;;  %v78_v29 = vadd.f32 %v70_v22, %v58_v16  ;;  %v67_v30 = vunpack.c.l.bf16 %v62_v18  ;;  %v68_v31 = vunpack.c.h.bf16 %v62_v18 }
  0x2c   :  { %v87_v25 = vrot.slane %v82_v14, %v425_v5  ;;  %v91_v26 = vrot.slane %v82_v14, %v90_v6  ;;  %v59_v32 = vunpack.c.l.bf16 %v52_v19  ;;  %v60_v35 = vunpack.c.h.bf16 %v52_v19 }
  0x2d   :  { %v71_v36 = vunpack.c.l.bf16 %v64_v24  ;;  %v75_v37 = vadd.f32 %v67_v30, %v55_v23  ;;  %v76_v38 = vadd.f32 %v68_v31, %v56_v28  ;;  %v72_v39 = vunpack.c.h.bf16 %v64_v24 }
  0x2e   :  { %v97_v33 = vrot.slane %v87_v25, %v425_v5  ;;  %v101_v34 = vrot.slane %v91_v26, %v425_v5  ;;  %v183_v31 = vsub.s32 1, %v419_v1 }
  0x2f   :  { %v79_v46 = vadd.f32 %v71_v36, %v59_v32  ;;  %v80_v47 = vadd.f32 %v72_v39, %v60_v35 }
  0x30   :  { %v102_v40 = vadd.f32 %v97_v33, %v73_v20  ;;  %v103_v41 = vadd.f32 %v101_v34, %v74_v21  ;;  %v106_v42 = vadd.f32 %v97_v33, %v77_v27  ;;  %v107_v43 = vadd.f32 %v101_v34, %v78_v29 }
  0x31   :  { %v104_v44 = vadd.f32 %v97_v33, %v75_v37  ;;  %v105_v45 = vadd.f32 %v101_v34, %v76_v38  ;;  %v108_v50 = vadd.f32 %v97_v33, %v79_v46  ;;  %v109_v51 = vadd.f32 %v101_v34, %v80_v47  ;;  %v175_v33 = vld [vmem:[%s458_s3] sm:$0x3]  ;;  %s358_s3 = smov [#allocation7]  }
  0x32   :  { %v110_v48 = vadd.f32 %v103_v41, %v102_v40  ;;  %v116_v49 = vadd.f32 %v107_v43, %v106_v42  ;;  %v195_v34 = vld [vmem:[%s459_s4] sm:$0x3]  ;;  %v180_v35 = vrot.slane %v175_v33, %v425_v5  ;;  %v184_v36 = vrot.slane %v175_v33, %v183_v31  ;;  %s248_s4 = sshll.u32 %s358_s3, 4  ;;  %s249_s4 = int_to_ptr.vmem [resolvable:$true] %s248_s4 }
  0x33   :  { %v113_v52 = vadd.f32 %v105_v45, %v104_v44  ;;  %v119_v53 = vadd.f32 %v109_v51, %v108_v50  ;;  %s326_s22 = scalar_lea.vmem %s249_s4, 512  ;;  %p331_p3 = scmp.lt.s32.totalorder %s249_s4, %s249_s4 }
  0x34   :  { %111 = vadd.xlane.f32.xlu0 %v110_v48  ;;  %117 = vadd.xlane.f32.xlu1 %v116_v49  ;;  %p327_p2 = scmp.ne.s32.totalorder %s249_s4, %s326_s22  ;;  %p332_p4 = scmp.lt.s32.totalorder %s326_s22, %s326_s22 }
  0x36   :  { %p333_p5 = por %p332_p4, %p331_p3 }
  0x38   :  { %114 = vadd.xlane.f32.xlu0 %v113_v52  ;;  %120 = vadd.xlane.f32.xlu1 %v119_v53  ;;  %p334_p6 = pnand %p333_p5, %p327_p2 }
  0xc1   :  { %v112_v54 = vpop.xlane.xlu0 %111  ;;  %v118_v55 = vpop.xlane.xlu1 %117 }
  0xc2   :  { %v123_v56 = vmul.f32 0.00390625, %v112_v54  ;;  %v125_v57 = vmul.f32 0.00390625, %v118_v55 }
  0xc4   :  { %v127_v58 = vsub.f32 %v102_v40, %v123_v56  ;;  %v128_v59 = vsub.f32 %v103_v41, %v123_v56  ;;  %v131_v60 = vsub.f32 %v106_v42, %v125_v57  ;;  %v132_v61 = vsub.f32 %v107_v43, %v125_v57 }
  0xc5   :  { %v115_v62 = vpop.xlane.xlu0 %114  ;;  %v121_v63 = vpop.xlane.xlu1 %120  ;;  %v200_v40 = vrot.slane %v195_v34, %v425_v5  ;;  %v204_v41 = vrot.slane %v195_v34, %v183_v31 }
  0xc6   :  { %v124_v0 = vmul.f32 0.00390625, %v115_v62  ;;  %v126_v2 = vmul.f32 0.00390625, %v121_v63  ;;  %v135_v3 = vmul.f32 %v127_v58, %v127_v58  ;;  %v136_v4 = vmul.f32 %v128_v59, %v128_v59 }
  0xc7   :  { %v139_v6 = vmul.f32 %v131_v60, %v131_v60  ;;  %v140_v7 = vmul.f32 %v132_v61, %v132_v61 }
  0xc8   :  { %v129_v8 = vsub.f32 %v104_v44, %v124_v0  ;;  %v130_v9 = vsub.f32 %v105_v45, %v124_v0  ;;  %v133_v10 = vsub.f32 %v108_v50, %v126_v2  ;;  %v134_v11 = vsub.f32 %v109_v51, %v126_v2 }
  0xc9   :  { %v143_v12 = vadd.f32 %v136_v4, %v135_v3  ;;  %v149_v17 = vadd.f32 %v140_v7, %v139_v6 }
  0xca   :  { %v137_v13 = vmul.f32 %v129_v8, %v129_v8  ;;  %v138_v14 = vmul.f32 %v130_v9, %v130_v9  ;;  %v141_v15 = vmul.f32 %v133_v10, %v133_v10  ;;  %v142_v16 = vmul.f32 %v134_v11, %v134_v11 }
  0xcb   :  { %144 = vadd.xlane.f32.xlu0 %v143_v12 }
  0xcc   :  { %v146_v18 = vadd.f32 %v138_v14, %v137_v13  ;;  %v152_v19 = vadd.f32 %v142_v16, %v141_v15 }
  0xce   :  { %147 = vadd.xlane.f32.xlu1 %v146_v18 }
  0xcf   :  { %150 = vadd.xlane.f32.xlu0 %v149_v17 }
  0xd2   :  { %153 = vadd.xlane.f32.xlu1 %v152_v19 }
 0x158   :  { %v145_v20 = vpop.xlane.xlu0 %144 }
 0x159   :  { %v155_v21 = vmul.f32 0.00390625, %v145_v20 }
 0x15b   :  { %v159_v22 = vadd.f32 1e-05, %v155_v21  ;;  %v148_v23 = vpop.xlane.xlu1 %147 }
 0x15c   :  { %v156_v24 = vmul.f32 0.00390625, %v148_v23  ;;  %v151_v25 = vpop.xlane.xlu0 %150 }
 0x15d   :  { %274 = vrsqrt.f32 %v159_v22  ;;  %v157_v26 = vmul.f32 0.00390625, %v151_v25 }
 0x15e   :  { %v160_v27 = vadd.f32 1e-05, %v156_v24 }
 0x15f   :  { %v161_v28 = vadd.f32 1e-05, %v157_v26  ;;  %v154_v29 = vpop.xlane.xlu1 %153 }
 0x160   :  { %276 = vrsqrt.f32 %v160_v27  ;;  %v158_v30 = vmul.f32 0.00390625, %v154_v29 }
 0x161   :  { %278 = vrsqrt.f32 %v161_v28 }
 0x162   :  { %v162_v32 = vadd.f32 1e-05, %v158_v30 }
 0x164   :  { %280 = vrsqrt.f32 %v162_v32 }
 0x167   :  { %v275_v37 = vpop.eup %274 }
 0x168   :  { %v167_v38 = vmul.f32 %v275_v37, %v127_v58  ;;  %v168_v39 = vmul.f32 %v275_v37, %v128_v59 }
 0x16a   :  { %v277_v1 = vpop.eup %276  ;;  %v187_v42 = vmul.f32 %v180_v35, %v167_v38  ;;  %v188_v43 = vmul.f32 %v184_v36, %v168_v39 }
 0x16b   :  { %v279_v44 = vpop.eup %278  ;;  %v169_v45 = vmul.f32 %v277_v1, %v129_v8  ;;  %v170_v46 = vmul.f32 %v277_v1, %v130_v9 }
 0x16c   :  { %v171_v47 = vmul.f32 %v279_v44, %v131_v60  ;;  %v172_v48 = vmul.f32 %v279_v44, %v132_v61  ;;  %v207_v49 = vadd.f32 %v200_v40, %v187_v42  ;;  %v208_v50 = vadd.f32 %v204_v41, %v188_v43 }
 0x16d   :  { %v189_v51 = vmul.f32 %v180_v35, %v169_v45  ;;  %v190_v52 = vmul.f32 %v184_v36, %v170_v46 }
 0x16e   :  { %v281_v53 = vpop.eup %280  ;;  %v191_v54 = vmul.f32 %v180_v35, %v171_v47  ;;  %v192_v55 = vmul.f32 %v184_v36, %v172_v48  ;;  %v265_v56 = vpack.c.bf16 %v208_v50, %v207_v49 }
 0x16f   :  { %v173_v57 = vmul.f32 %v281_v53, %v133_v10  ;;  %v174_v58 = vmul.f32 %v281_v53, %v134_v11  ;;  %v209_v5 = vadd.f32 %v200_v40, %v189_v51  ;;  %v210_v59 = vadd.f32 %v204_v41, %v190_v52 }
 0x170   :  { %v211_v62 = vadd.f32 %v200_v40, %v191_v54  ;;  %v212_v63 = vadd.f32 %v204_v41, %v192_v55  ;;  %239 = vst [vmem:[#allocation7] sm:$0xff] %v265_v56 }
 0x171   :  { %v193_v0 = vmul.f32 %v180_v35, %v173_v57  ;;  %v194_v2 = vmul.f32 %v184_v36, %v174_v58  ;;  %v266_v3 = vpack.c.bf16 %v210_v59, %v209_v5 }
 0x172   :  { %v267_v60 = vpack.c.bf16 %v212_v63, %v211_v62 }
 0x173   :  { %v213_v61 = vadd.f32 %v200_v40, %v193_v0  ;;  %v214_v4 = vadd.f32 %v204_v41, %v194_v2  ;;  %240 = vst [vmem:[#allocation7 + $0x8] sm:$0xff] %v266_v3 }
 0x174   :  { %241 = vst [vmem:[#allocation7 + $0x10] sm:$0xff] %v267_v60 }
 0x175   :  { %v268_v6 = vpack.c.bf16 %v214_v4, %v213_v61 }
 0x177   :  { %242 = vst [vmem:[#allocation7 + $0x18] sm:$0xff] %v268_v6 }
 0x178   :  { %337 = shalt.err (!%p334_p6)
}
 0x179   :  { %s338_s25 = scalar_lea.hbm %s460_s5, 512 }
 0x17a   :  { %p339_p7 = scmp.ne.s32.totalorder %s460_s5, %s338_s25  ;;  %p342_p8 = scmp.lt.u32.totalorder %s338_s25, %s460_s5 }
 0x17c   :  { %p344_p9 = pnand %p342_p8, %p339_p7 }
 0x17e   :  { %347 = shalt.err (!%p344_p9)
}
 0x17f   :  { %254 = dma.vmem_to_hbm [thread:$0]  %s249_s4, 512, %s460_s5, [#allocation4], %s355_s28, %s355_s28, %s356_s29  }
 0x180   :  { %352 = dma.done.wait [#allocation4], 512  }
 0x181   :  { %353 = vsyncadd [#allocation4], 4294966784 }
 0x182   :  { %258 = vsyncpa [#allocation3], 1 }
 0x183   :  { %259 = vsyncpa [#allocation6], 1 }
 0x184   :  { %260 = vsyncpa [#allocation4], 1 }

</bundles_post_ra>
